<compile_context>
chip_gen: v7x
topology: tpu7x:2x2x1
jax: 0.10.0
libtpu: 0.0.40
codegen_flags: <defaults>
</compile_context>

<pallas_src>
import itertools
import functools

import numpy as np
import jax
import jax.numpy as jnp
from jax.experimental import pallas as pl
from jax.experimental.pallas import tpu as pltpu


def _round_up(n, m):
    return ((n + m - 1) // m) * m


def _make_wfun(smoothness):
    if smoothness == 1:
        return lambda w: w
    elif smoothness == 2:
        return lambda w: (3.0 - 2.0 * w) * w * w
    elif smoothness == 3:
        return lambda w: (10.0 + w * (6.0 * w - 15.0)) * w * w * w
    raise ValueError("Smoothness must be 1, 2, or 3.")


def init_grads(key, n_dims, n_fields, res):
    """Deterministic stand-in for torch init_grads: normal, L2-normalized over last dim."""
    shape = (res + 1,) * n_dims + (n_fields, n_dims)
    g = jax.random.normal(key, shape, dtype=jnp.float32)
    norm = jnp.maximum(jnp.linalg.norm(g, axis=-1, keepdims=True), 1e-12)
    return g / norm


def _build_corner_table_T(grads_full, *, n_dims, n_fields, res, periodic):
    """(res+1,)^D + (F, D) gradients -> transposed table (2^D * D * Fp, G_pad).

    Row block for corner ci / dimension d (Fp = round_up(F, 8) rows, zero
    padded) holds, for every flat lattice cell g (C-order over idxA), the d-th
    gradient component of lattice vertex idxA + corner (periodic wrap baked
    in).  This turns the 2^D data-dependent corner gathers into one one-hot
    matmul; the transposed layout keeps the batch on the lane axis downstream.
    """
    G = (res + 1) ** n_dims
    fp = _round_up(n_fields, 8)
    grads_flat = np.asarray(grads_full).reshape(G, n_fields, n_dims)  # (G, F, D)

    base = np.indices((res + 1,) * n_dims).reshape(n_dims, G).T       # (G, D)
    strides = np.array([(res + 1) ** (n_dims - 1 - i) for i in range(n_dims)])

    blocks = []
    for corner in itertools.product((0, 1), repeat=n_dims):
        shifted = base + np.array(corner)
        if periodic:
            shifted = np.where(shifted == res, 0, shifted)
        # Rows with base_i == res are never selected by idxA; clamp to stay in-bounds.
        shifted = np.minimum(shifted, res)
        flat = (shifted * strides).sum(-1)                            # (G,)
        g_c = grads_flat[flat]                                        # (G, F, D)
        for d in range(n_dims):
            blk = g_c[:, :, d].T                                      # (F, G)
            if fp != n_fields:
                blk = np.pad(blk, ((0, fp - n_fields), (0, 0)))       # (Fp, G)
            blocks.append(blk)
    table = np.concatenate(blocks, axis=0)                            # (2^D*D*Fp, G)

    G_pad = _round_up(G, 128)                                         # lane-align K dim
    if G_pad != G:
        table = np.pad(table, ((0, 0), (0, G_pad - G)))
    return jnp.asarray(table, dtype=jnp.float32), fp


def _perlin_kernel(x_ref, table_ref, out_ref, *, n_dims, fp, res,
                   smoothness, multiplier):
    # x_ref:     (D, TB)                float32   (batch on lanes)
    # table_ref: (2^D*D*Fp, G_pad)      float32   (corner-shifted gradients, transposed)
    # out_ref:   (Fp, TB)               float32   (lane-dense store)
    wfun = _make_wfun(smoothness)
    fres = float(res)

    x = x_ref[...].astype(jnp.float32) * fres
    x = x - jnp.trunc(x / fres) * fres            # torch.fmod(x * res, res)
    locs = x - jnp.trunc(x)                       # torch.frac          (D, TB)
    idxA = jnp.floor(x).astype(jnp.int32)         # (D, TB)

    tb = x.shape[1]
    strides = [(res + 1) ** (n_dims - 1 - i) for i in range(n_dims)]
    flat = idxA[0:1, :] * strides[0]
    for i in range(1, n_dims):
        flat = flat + idxA[i:i + 1, :] * strides[i]                   # (1, TB)

    # Single one-hot (VPU) + single MXU matmul gathering all 2^D corners.
    G_pad = table_ref.shape[1]
    iota_g = jax.lax.broadcasted_iota(jnp.int32, (G_pad, tb), 0)
    onehot = (iota_g == flat).astype(jnp.float32)                     # (G_pad, TB)
    comp = jnp.dot(table_ref[...], onehot,
                   preferred_element_type=jnp.float32)                # (C_pad, TB)

    # Offsets hoisted out of the corner loop: one (locs_d, locs_d - 1) pair
    # per dimension, broadcast once to the full (Fp, TB) tile.
    off = []
    for d in range(n_dims):
        l = locs[d:d + 1, :]                                          # (1, TB)
        off.append((jnp.broadcast_to(l, (fp, tb)),
                    jnp.broadcast_to(l - 1.0, (fp, tb))))

    # Per-corner gradient . offset (lane-dense VPU work, sublane-aligned slices).
    corner_vals = {}
    for ci, corner in enumerate(itertools.product((0, 1), repeat=n_dims)):
        row = ci * n_dims * fp
        val = comp[row:row + fp, :] * off[0][corner[0]]
        for d in range(1, n_dims):
            r = (ci * n_dims + d) * fp
            val = val + comp[r:r + fp, :] * off[d][corner[d]]
        corner_vals[corner] = val

    # Smoothstep lerp cascade; wfun(w) computed on (1, TB) and broadcast once per level.
    for i in range(n_dims):
        w = jnp.broadcast_to(wfun(locs[i:i + 1, :]), (fp, tb))
        merged = {}
        for rest in itertools.product((0, 1), repeat=n_dims - 1 - i):
            a = corner_vals[(0,) + rest]
            b = corner_vals[(1,) + rest]
            merged[rest] = a + w * (b - a)                            # torch.lerp
        corner_vals = merged

    out_ref[...] = (corner_vals[()] * multiplier).astype(out_ref.dtype)


def _choose_block_b(B, G_pad, C_pad, fp, n_dims, requested=None):
    if requested is not None:
        return requested
    # Batch is the lane axis -> block must be a multiple of 128.
    if B <= 128:
        bb = 128                                   # single small step; minimal padding
    else:
        # >=2 grid iterations so the "parallel" axis can shard over the 2 TCs
        # on v7x; cap at 512 so v5e/v6e take few, large steps.
        bb = min(512, _round_up(-(-B // 2), 128))
    # VMEM budget: double-buffered table + x/out blocks + onehot + comp +
    # per-corner/lerp intermediates; keep under ~40 MiB (v7x has 64 MiB/TC).
    table_bytes = 2 * C_pad * G_pad * 4
    n_corners = 2 ** n_dims
    per_col_bytes = (G_pad                      # onehot + iota
                     + 2 * C_pad                # comp + matmul staging
                     + (n_corners + 2 * n_dims + 6) * fp   # corner_vals, off, lerp tmps
                     + 2 * n_dims + 4 * fp) * 4            # x / out blocks (x2 buffers)
    budget = 40 * 1024 * 1024
    while bb > 128 and table_bytes + bb * per_col_bytes > budget:
        bb -= 128
    return bb


def perlin_noise(x, grads_full, *, n_dims, n_fields, res, smoothness=1,
                 periodic=False, multiplier=1.0, block_b=None):
    B = x.shape[0]
    assert x.shape == (B, n_dims)

    table_T, fp = _build_corner_table_T(grads_full, n_dims=n_dims,
                                        n_fields=n_fields, res=res,
                                        periodic=periodic)
    C_pad, G_pad = table_T.shape

    bb = _choose_block_b(B, G_pad, C_pad, fp, n_dims, block_b)
    B_pad = _round_up(B, bb)
    x_t = jnp.pad(x.astype(jnp.float32).T, ((0, 0), (0, B_pad - B)))   # (D, B_pad)
    grid = (B_pad // bb,)          # "parallel" batch axis -> megacore / 2-TC

    kernel = functools.partial(
        _perlin_kernel, n_dims=n_dims, fp=fp, res=res,
        smoothness=smoothness, multiplier=multiplier)

    out_t = pl.pallas_call(
        kernel,
        out_shape=jax.ShapeDtypeStruct((fp, B_pad), jnp.float32),
        grid=grid,
        in_specs=[
            pl.BlockSpec((n_dims, bb), lambda i: (0, i)),
            pl.BlockSpec((C_pad, G_pad), lambda i: (0, 0)),   # grid-invariant table
        ],
        out_specs=pl.BlockSpec((fp, bb), lambda i: (0, i)),
        compiler_params=pltpu.CompilerParams(
            dimension_semantics=("parallel",),
            vmem_limit_bytes=48 * 1024 * 1024),
    )(x_t, table_T)
    return out_t[:n_fields, :B].T                                      # (B, F)


def perlin_noise_ref(x, grads_full, *, n_dims, res, smoothness, periodic, multiplier):
    """Pure-JAX transcription of the torch forward, for verification."""
    wfun = _make_wfun(smoothness)
    fres = float(res)
    xr = x * fres
    xr = xr - jnp.trunc(xr / fres) * fres
    locs = xr - jnp.trunc(xr)
    idxA = jnp.floor(xr).astype(jnp.int32)
    idxB = idxA + 1
    if periodic:
        idxB = jnp.where(idxB == res, 0, idxB)
    idx = jnp.stack((idxA, idxB), axis=-1)                  # (B, D, 2)
    offsets = jnp.stack((locs, locs - 1.0), axis=-1)        # (B, D, 2)
    corners = jnp.meshgrid(*((jnp.array([0, 1]),) * n_dims), indexing='ij')
    idx_verts = jnp.stack([idx[:, i][:, corners[i]] for i in range(n_dims)], axis=-1)
    off_verts = jnp.stack([offsets[:, i][:, corners[i]] for i in range(n_dims)],
                          axis=-1)[..., None, :]
    g = grads_full[tuple(idx_verts[..., i] for i in range(n_dims))]
    vals = jnp.sum(g * off_verts, axis=-1)
    for i in range(n_dims):
        w = locs[:, i][(slice(None),) + (None,) * (n_dims - i)]
        vals = vals[:, 0] + wfun(w) * (vals[:, 1] - vals[:, 0])
    return vals * multiplier


if __name__ == "__main__":
    configs = [
        dict(n_dims=2, n_fields=4, res=8, smoothness=2, periodic=False,
             multiplier=1.0, B=16),
        dict(n_dims=3, n_fields=4, res=4, smoothness=3, periodic=True,
             multiplier=0.5, B=32),
    ]
    for cfg in configs:
        n_dims, n_fields, res = cfg["n_dims"], cfg["n_fields"], cfg["res"]
        smoothness, periodic = cfg["smoothness"], cfg["periodic"]
        multiplier, B = cfg["multiplier"], cfg["B"]

        key = jax.random.PRNGKey(0)
        kx, kg = jax.random.split(key)
        x = jax.random.uniform(kx, (B, n_dims), dtype=jnp.float32)  # points in [0, 1)
        grads_full = init_grads(kg, n_dims, n_fields, res)

        out = perlin_noise(x, grads_full, n_dims=n_dims, n_fields=n_fields,
                           res=res, smoothness=smoothness, periodic=periodic,
                           multiplier=multiplier)
        out = jax.block_until_ready(out)

        ref = perlin_noise_ref(x, grads_full, n_dims=n_dims, res=res,
                               smoothness=smoothness, periodic=periodic,
                               multiplier=multiplier)
        assert out.shape == (B, n_fields)
        np.testing.assert_allclose(np.asarray(out), np.asarray(ref),
                                   rtol=1e-4, atol=1e-5)
    print("KERNEL_OK")
</pallas_src>

<mosaic_0001>
module attributes {stable_mosaic.version = 11 : i64} {
  func.func @_perlin_kernel(%arg0: i32, %arg1: memref<2x128xf32, #tpu.memory_space<vmem>>, %arg2: memref<64x128xf32, #tpu.memory_space<vmem>>, %arg3: memref<8x128xf32, #tpu.memory_space<vmem>>) attributes {dimension_semantics = [#tpu.dimension_semantics<parallel>], iteration_bounds = array<i64: 1>, scalar_prefetch = 0 : i64, scratch_operands = 0 : i64, tpu.core_type = #tpu.core_type<tc>, window_params = [{transform_indices = @transform_0, window_bounds = array<i64: 2, 128>}, {pipeline_mode = #tpu.pipeline_mode<synchronous>, transform_indices = @transform_1, window_bounds = array<i64: 64, 128>}, {transform_indices = @transform_2, window_bounds = array<i64: 8, 128>}]} {
    %c0 = arith.constant 0 : index
    %c0_0 = arith.constant 0 : index
    %0 = vector.load %arg1[%c0, %c0_0] : memref<2x128xf32, #tpu.memory_space<vmem>>, vector<2x128xf32>
    %cst = arith.constant 8.000000e+00 : f32
    %1 = vector.broadcast %cst : f32 to vector<2x128xf32>
    %2 = arith.mulf %0, %1 : vector<2x128xf32>
    %cst_1 = arith.constant 8.000000e+00 : f32
    %3 = vector.broadcast %cst_1 : f32 to vector<2x128xf32>
    %4 = arith.divf %2, %3 : vector<2x128xf32>
    %cst_2 = arith.constant 0.000000e+00 : f32
    %5 = vector.broadcast %cst_2 : f32 to vector<2x128xf32>
    %6 = arith.cmpf olt, %4, %5 : vector<2x128xf32>
    %7 = math.ceil %4 : vector<2x128xf32>
    %8 = math.floor %4 : vector<2x128xf32>
    %9 = arith.select %6, %7, %8 : vector<2x128xi1>, vector<2x128xf32>
    %cst_3 = arith.constant 8.000000e+00 : f32
    %10 = vector.broadcast %cst_3 : f32 to vector<2x128xf32>
    %11 = arith.mulf %9, %10 : vector<2x128xf32>
    %12 = arith.subf %2, %11 : vector<2x128xf32>
    %cst_4 = arith.constant 0.000000e+00 : f32
    %13 = vector.broadcast %cst_4 : f32 to vector<2x128xf32>
    %14 = arith.cmpf olt, %12, %13 : vector<2x128xf32>
    %15 = math.ceil %12 : vector<2x128xf32>
    %16 = math.floor %12 : vector<2x128xf32>
    %17 = arith.select %14, %15, %16 : vector<2x128xi1>, vector<2x128xf32>
    %18 = arith.subf %12, %17 : vector<2x128xf32>
    %19 = math.floor %12 : vector<2x128xf32>
    %20 = arith.fptosi %19 : vector<2x128xf32> to vector<2x128xi32>
    %21 = vector.extract_strided_slice %20 {offsets = [0, 0], sizes = [1, 128], strides = [1, 1]} : vector<2x128xi32> to vector<1x128xi32>
    %c9_i32 = arith.constant 9 : i32
    %22 = vector.broadcast %c9_i32 : i32 to vector<1x128xi32>
    %23 = arith.muli %21, %22 : vector<1x128xi32>
    %24 = vector.extract_strided_slice %20 {offsets = [1, 0], sizes = [1, 128], strides = [1, 1]} : vector<2x128xi32> to vector<1x128xi32>
    %c1_i32 = arith.constant 1 : i32
    %25 = vector.broadcast %c1_i32 : i32 to vector<1x128xi32>
    %26 = arith.muli %24, %25 : vector<1x128xi32>
    %27 = arith.addi %23, %26 : vector<1x128xi32>
    %28 = tpu.iota {dimensions = array<i32: 0>} : vector<128x128xi32>
    %29 = vector.broadcast %27 : vector<1x128xi32> to vector<128x128xi32>
    %30 = arith.cmpi eq, %28, %29 : vector<128x128xi32>
    %31 = arith.extui %30 : vector<128x128xi1> to vector<128x128xi32>
    %32 = arith.sitofp %31 : vector<128x128xi32> to vector<128x128xf32>
    %c0_5 = arith.constant 0 : index
    %c0_6 = arith.constant 0 : index
    %33 = vector.load %arg2[%c0_5, %c0_6] : memref<64x128xf32, #tpu.memory_space<vmem>>, vector<64x128xf32>
    %cst_7 = arith.constant dense<0.000000e+00> : vector<64x128xf32>
    %34 = tpu.matmul %33, %32, %cst_7 {dimension_numbers = #tpu.dot_dimension_numbers<[1], [0], [0], [1], [0, 0, 1, 1], [], []>} : vector<64x128xf32>, vector<128x128xf32>, vector<64x128xf32> -> vector<64x128xf32>
    %35 = vector.extract_strided_slice %18 {offsets = [0, 0], sizes = [1, 128], strides = [1, 1]} : vector<2x128xf32> to vector<1x128xf32>
    %36 = vector.shape_cast %35 : vector<1x128xf32> to vector<1x128xf32>
    %37 = vector.broadcast %36 : vector<1x128xf32> to vector<8x128xf32>
    %cst_8 = arith.constant 1.000000e+00 : f32
    %38 = vector.broadcast %cst_8 : f32 to vector<1x128xf32>
    %39 = arith.subf %35, %38 : vector<1x128xf32>
    %40 = vector.shape_cast %39 : vector<1x128xf32> to vector<1x128xf32>
    %41 = vector.broadcast %40 : vector<1x128xf32> to vector<8x128xf32>
    %42 = vector.extract_strided_slice %18 {offsets = [1, 0], sizes = [1, 128], strides = [1, 1]} : vector<2x128xf32> to vector<1x128xf32>
    %43 = vector.shape_cast %42 : vector<1x128xf32> to vector<1x128xf32>
    %44 = vector.broadcast %43 : vector<1x128xf32> to vector<8x128xf32>
    %cst_9 = arith.constant 1.000000e+00 : f32
    %45 = vector.broadcast %cst_9 : f32 to vector<1x128xf32>
    %46 = arith.subf %42, %45 : vector<1x128xf32>
    %47 = vector.shape_cast %46 : vector<1x128xf32> to vector<1x128xf32>
    %48 = vector.broadcast %47 : vector<1x128xf32> to vector<8x128xf32>
    %49 = vector.extract_strided_slice %34 {offsets = [0, 0], sizes = [8, 128], strides = [1, 1]} : vector<64x128xf32> to vector<8x128xf32>
    %50 = arith.mulf %49, %37 : vector<8x128xf32>
    %51 = vector.extract_strided_slice %34 {offsets = [8, 0], sizes = [8, 128], strides = [1, 1]} : vector<64x128xf32> to vector<8x128xf32>
    %52 = arith.mulf %51, %44 : vector<8x128xf32>
    %53 = arith.addf %50, %52 : vector<8x128xf32>
    %54 = vector.extract_strided_slice %34 {offsets = [16, 0], sizes = [8, 128], strides = [1, 1]} : vector<64x128xf32> to vector<8x128xf32>
    %55 = arith.mulf %54, %37 : vector<8x128xf32>
    %56 = vector.extract_strided_slice %34 {offsets = [24, 0], sizes = [8, 128], strides = [1, 1]} : vector<64x128xf32> to vector<8x128xf32>
    %57 = arith.mulf %56, %48 : vector<8x128xf32>
    %58 = arith.addf %55, %57 : vector<8x128xf32>
    %59 = vector.extract_strided_slice %34 {offsets = [32, 0], sizes = [8, 128], strides = [1, 1]} : vector<64x128xf32> to vector<8x128xf32>
    %60 = arith.mulf %59, %41 : vector<8x128xf32>
    %61 = vector.extract_strided_slice %34 {offsets = [40, 0], sizes = [8, 128], strides = [1, 1]} : vector<64x128xf32> to vector<8x128xf32>
    %62 = arith.mulf %61, %44 : vector<8x128xf32>
    %63 = arith.addf %60, %62 : vector<8x128xf32>
    %64 = vector.extract_strided_slice %34 {offsets = [48, 0], sizes = [8, 128], strides = [1, 1]} : vector<64x128xf32> to vector<8x128xf32>
    %65 = arith.mulf %64, %41 : vector<8x128xf32>
    %66 = vector.extract_strided_slice %34 {offsets = [56, 0], sizes = [8, 128], strides = [1, 1]} : vector<64x128xf32> to vector<8x128xf32>
    %67 = arith.mulf %66, %48 : vector<8x128xf32>
    %68 = arith.addf %65, %67 : vector<8x128xf32>
    %69 = vector.extract_strided_slice %18 {offsets = [0, 0], sizes = [1, 128], strides = [1, 1]} : vector<2x128xf32> to vector<1x128xf32>
    %cst_10 = arith.constant 2.000000e+00 : f32
    %70 = vector.broadcast %cst_10 : f32 to vector<1x128xf32>
    %71 = arith.mulf %70, %69 : vector<1x128xf32>
    %cst_11 = arith.constant 3.000000e+00 : f32
    %72 = vector.broadcast %cst_11 : f32 to vector<1x128xf32>
    %73 = arith.subf %72, %71 : vector<1x128xf32>
    %74 = arith.mulf %73, %69 : vector<1x128xf32>
    %75 = arith.mulf %74, %69 : vector<1x128xf32>
    %76 = vector.shape_cast %75 : vector<1x128xf32> to vector<1x128xf32>
    %77 = vector.broadcast %76 : vector<1x128xf32> to vector<8x128xf32>
    %78 = arith.subf %63, %53 : vector<8x128xf32>
    %79 = arith.mulf %77, %78 : vector<8x128xf32>
    %80 = arith.addf %53, %79 : vector<8x128xf32>
    %81 = arith.subf %68, %58 : vector<8x128xf32>
    %82 = arith.mulf %77, %81 : vector<8x128xf32>
    %83 = arith.addf %58, %82 : vector<8x128xf32>
    %84 = vector.extract_strided_slice %18 {offsets = [1, 0], sizes = [1, 128], strides = [1, 1]} : vector<2x128xf32> to vector<1x128xf32>
    %cst_12 = arith.constant 2.000000e+00 : f32
    %85 = vector.broadcast %cst_12 : f32 to vector<1x128xf32>
    %86 = arith.mulf %85, %84 : vector<1x128xf32>
    %cst_13 = arith.constant 3.000000e+00 : f32
    %87 = vector.broadcast %cst_13 : f32 to vector<1x128xf32>
    %88 = arith.subf %87, %86 : vector<1x128xf32>
    %89 = arith.mulf %88, %84 : vector<1x128xf32>
    %90 = arith.mulf %89, %84 : vector<1x128xf32>
    %91 = vector.shape_cast %90 : vector<1x128xf32> to vector<1x128xf32>
    %92 = vector.broadcast %91 : vector<1x128xf32> to vector<8x128xf32>
    %93 = arith.subf %83, %80 : vector<8x128xf32>
    %94 = arith.mulf %92, %93 : vector<8x128xf32>
    %95 = arith.addf %80, %94 : vector<8x128xf32>
    %cst_14 = arith.constant 1.000000e+00 : f32
    %96 = vector.broadcast %cst_14 : f32 to vector<8x128xf32>
    %97 = arith.mulf %95, %96 : vector<8x128xf32>
    %c0_15 = arith.constant 0 : index
    %c0_16 = arith.constant 0 : index
    %98 = vector.load %arg3[%c0_15, %c0_16] : memref<8x128xf32, #tpu.memory_space<vmem>>, vector<8x128xf32>
    tpu.vector_store %arg3[%c0_15, %c0_16], %97 {strides = array<i32>} : memref<8x128xf32, #tpu.memory_space<vmem>>, vector<8x128xf32>,
    return
  }
  func.func @transform_0(%arg0: i32) -> (i32, i32) {
    %c0_i32 = arith.constant 0 : i32
    %c0_i32_0 = arith.constant 0 : i32
    return %c0_i32, %arg0 : i32, i32
  }
  func.func @transform_1(%arg0: i32) -> (i32, i32) {
    %c0_i32 = arith.constant 0 : i32
    %c0_i32_0 = arith.constant 0 : i32
    %c0_i32_1 = arith.constant 0 : i32
    return %c0_i32, %c0_i32_0 : i32, i32
  }
  func.func @transform_2(%arg0: i32) -> (i32, i32) {
    %c0_i32 = arith.constant 0 : i32
    %c0_i32_0 = arith.constant 0 : i32
    return %c0_i32, %arg0 : i32, i32
  }
}

</mosaic_0001>

<bundles_post_ra>
// kernel: tpu_custom_call.1
= control target key start
LH: loop header
LB: loop body
LE: loop exit
PB: predicated region body
PF: predicated region fallthrough
CT: control target
= control target key end

     0   :  { %7 = vsyncpa [#allocation3], 0  ;;  %s651_s0 = inlined_call_operand.hbm [shape: f32[2,128], index: 0, kind: input, shape index: {}]   ;;  %s652_s1 = inlined_call_operand.hbm [shape: f32[64,128], index: 1, kind: input, shape index: {}]   ;;  %s653_s2 = inlined_call_operand.hbm [shape: f32[8,128], index: 2, kind: output, shape index: {}]  }
   0x1   :  { %8 = vsyncpa [#allocation6], 0 }
   0x2   :  { %9 = vsyncpa [#allocation4], 0  ;;  %s535_s9 = smov [#allocation2]   ;;  %s536_s11 = smov [#allocation5]  }
   0x3   :  { %s16_s10 = sshll.u32 %s535_s9, 4  ;;  %s25_s12 = sshll.u32 %s536_s11, 4  ;;  %s17_s10 = int_to_ptr.vmem [resolvable:$true] %s16_s10  ;;  %s556_s12 = int_to_ptr.vmem [resolvable:$true] %s25_s12 }
   0x4   :  { %s463_s15 = scalar_lea.hbm %s651_s0, 32 }
   0x5   :  { %p464_p0 = scmp.ne.s32.totalorder %s651_s0, %s463_s15  ;;  %p467_p1 = scmp.lt.u32.totalorder %s463_s15, %s651_s0 }
   0x7   :  { %p469_p2 = pnand %p467_p1, %p464_p0 }
   0x9   :  { %472 = shalt.err (!%p469_p2)
}
   0xa   :  { %s473_s20 = scalar_lea.vmem %s17_s10, 32  ;;  %p478_p4 = scmp.lt.s32.totalorder %s17_s10, %s17_s10 }
   0xb   :  { %p474_p3 = scmp.ne.s32.totalorder %s17_s10, %s473_s20  ;;  %p479_p5 = scmp.lt.s32.totalorder %s473_s20, %s473_s20 }
   0xd   :  { %p480_p6 = por %p479_p5, %p478_p4 }
   0xf   :  { %p481_p7 = pnand %p480_p6, %p474_p3 }
  0x11   :  { %484 = shalt.err (!%p481_p7)
}
  0x12   :  { %19 = dma.hbm_to_vmem [thread:$0]  %s651_s0, 32, %s17_s10, [#allocation3]  }
  0x13   :  { %s485_s25 = scalar_lea.hbm %s652_s1, 1024 }
  0x14   :  { %p486_p8 = scmp.ne.s32.totalorder %s652_s1, %s485_s25  ;;  %p489_p9 = scmp.lt.u32.totalorder %s485_s25, %s652_s1 }
  0x16   :  { %p491_p10 = pnand %p489_p9, %p486_p8 }
  0x18   :  { %494 = shalt.err (!%p491_p10)
}
  0x19   :  { %s495_s30 = scalar_lea.vmem %s556_s12, 1024  ;;  %p500_p12 = scmp.lt.s32.totalorder %s556_s12, %s556_s12 }
  0x1a   :  { %p496_p11 = scmp.ne.s32.totalorder %s556_s12, %s495_s30  ;;  %p501_p13 = scmp.lt.s32.totalorder %s495_s30, %s495_s30 }
  0x1c   :  { %p502_p0 = por %p501_p13, %p500_p12 }
  0x1e   :  { %p503_p1 = pnand %p502_p0, %p496_p11 }
  0x20   :  { %506 = shalt.err (!%p503_p1)
}
  0x21   :  { %s537_s0 = smov 128   ;;  %s538_s3 = smov 8  }
  0x22   :  { %31 = dma.hbm_to_vmem [thread:$0]  %s652_s1, 1024, %s556_s12, [#allocation6], %s537_s0, %s537_s0, %s538_s3  }
  0x23   :  { %529 = dma.done.wait [#allocation3], 32  }
  0x24   :  { %530 = vsyncadd [#allocation3], 4294967264 }
  0x25   :  { %531 = dma.done.wait [#allocation6], 1024  }
  0x26   :  { %532 = vsyncadd [#allocation6], 4294966272  ;;  %v38_v0 = vld [vmem:[#allocation2] sm:$0x3]  ;;  %v126_v2 = vld [vmem:[#allocation5] sm:$0xff]  ;;  %v57_v10 = vlaneseq  ;;  %s540_s1 = smov [#allocation7]  }
  0x27   :  { %v39_v1 = vmul.f32 8.0, %v38_v0  ;;  %v130_v3 = vld [vmem:[#allocation5 + $0x20] sm:$0xff]  ;;  %395 = vmatprep.mubr.f32.mxu0 %v126_v2  ;;  %v539_v28 = vmov 1.0|1.0   ;;  %v127_v39 = vld [vmem:[#allocation5 + $0x8] sm:$0xff]  ;;  %v128_v41 = vld [vmem:[#allocation5 + $0x10] sm:$0xff] }
  0x28   :  { %401 = vmatprep.mubr.f32.mxu1 %v130_v3  ;;  %v587_v14 = vshrl.u32 %v57_v10, 7  ;;  %v131_v40 = vld [vmem:[#allocation5 + $0x28] sm:$0xff]  ;;  %v132_v42 = vld [vmem:[#allocation5 + $0x30] sm:$0xff]  ;;  %v129_v43 = vld [vmem:[#allocation5 + $0x18] sm:$0xff]  ;;  %s296_s6 = sshll.u32 %s540_s1, 4  ;;  %s297_s6 = int_to_ptr.vmem [resolvable:$true] %s296_s6 }
  0x29   :  { %v41_v4 = vmul.f32 0.125, %v39_v1  ;;  %v133_v44 = vld [vmem:[#allocation5 + $0x38] sm:$0xff]  ;;  %s507_s7 = scalar_lea.vmem %s297_s6, 128  ;;  %p512_p3 = scmp.lt.s32.totalorder %s297_s6, %s297_s6 }
  0x2a   :  { %v592_v20 = vsub.s32 0, %v587_v14  ;;  %v59_v22 = vadd.s32 8, %v587_v14  ;;  %v60_v23 = vadd.s32 16, %v587_v14  ;;  %v61_v24 = vadd.s32 24, %v587_v14  ;;  %p508_p2 = scmp.ne.s32.totalorder %s297_s6, %s507_s7  ;;  %p513_p4 = scmp.lt.s32.totalorder %s507_s7, %s507_s7 }
  0x2b   :  { %vm42_vm0 = vcmp.lt.f32.partialorder %v41_v4, 0.0  ;;  %v43_v5 = vceil.f32 %v41_v4  ;;  %v44_v6 = vfloor.f32 %v41_v4  ;;  %v62_v26 = vadd.s32 32, %v587_v14 }
  0x2c   :  { %v63_v27 = vadd.s32 40, %v587_v14  ;;  %v64_v29 = vadd.s32 48, %v587_v14  ;;  %v65_v30 = vadd.s32 56, %v587_v14  ;;  %v66_v31 = vadd.s32 64, %v587_v14  ;;  %p514_p5 = por %p513_p4, %p512_p3 }
  0x2d   :  { %v45_v7 = vsel %vm42_vm0, %v43_v5, %v44_v6  ;;  %v67_v32 = vadd.s32 72, %v587_v14  ;;  %v68_v33 = vadd.s32 80, %v587_v14  ;;  %v69_v34 = vadd.s32 88, %v587_v14 }
  0x2e   :  { %v46_v8 = vmul.f32 8.0, %v45_v7  ;;  %v70_v35 = vadd.s32 96, %v587_v14  ;;  %v71_v36 = vadd.s32 104, %v587_v14  ;;  %v72_v37 = vadd.s32 112, %v587_v14  ;;  %p515_p6 = pnand %p514_p5, %p508_p2 }
  0x2f   :  { %v73_v38 = vadd.s32 120, %v587_v14  ;;  %v250_v47 = vsub.s32 1, %v587_v14 }
  0x30   :  { %v47_v9 = vsub.f32 %v39_v1, %v46_v8 }
  0x32   :  { %v50_v11 = vfloor.f32 %v47_v9  ;;  %vm48_vm1 = vcmp.lt.f32.partialorder %v47_v9, 0.0  ;;  %v49_v12 = vceil.f32 %v47_v9 }
  0x34   :  { %v455_v13 = vtrunc.f32 %v50_v11  ;;  %v51_v15 = vsel %vm48_vm1, %v49_v12, %v50_v11 }
  0x35   :  { %v589_v16 = vsub.f32 %v47_v9, %v51_v15 }
  0x36   :  { %v456_v17 = vcvt.f32.s32 %v455_v13 }
  0x37   :  { %v268_v45 = vmul.f32 2.0, %v589_v16  ;;  %v338_v48 = vadd.f32 -1.0, %v589_v16  ;;  %v251_v50 = vrot.slane %v589_v16, %v250_v47  ;;  %v242_v51 = vrot.slane %v589_v16, %v592_v20 }
  0x38   :  { %v54_v18 = vmul.u32 9, %v456_v17  ;;  %v55_v19 = vrot.slane %v456_v17, 1 }
  0x39   :  { %v269_v46 = vsub.f32 3.0, %v268_v45  ;;  %v247_v52 = vrot.slane %v338_v48, %v592_v20  ;;  %v255_v60 = vrot.slane %v338_v48, %v250_v47 }
  0x3a   :  { %v56_v21 = vadd.s32 %v55_v19, %v54_v18 }
  0x3b   :  { %v270_v49 = vmul.f32 %v269_v46, %v589_v16 }
  0x3c   :  { %v598_v25 = vrot.slane %v56_v21, %v592_v20 }
  0x3d   :  { %v271_v55 = vmul.f32 %v270_v49, %v589_v16 }
  0x3e   :  { %vm78_vm2 = vcmp.eq.s32.totalorder %v587_v14, %v598_v25  ;;  %vm79_vm3 = vcmp.eq.s32.totalorder %v59_v22, %v598_v25  ;;  %vm80_vm4 = vcmp.eq.s32.totalorder %v60_v23, %v598_v25  ;;  %vm81_vm5 = vcmp.eq.s32.totalorder %v61_v24, %v598_v25 }
  0x3f   :  { %vm407_vm6 = vmpackc.low %vm79_vm3, %vm78_vm2  ;;  %vm82_vm8 = vcmp.eq.s32.totalorder %v62_v26, %v598_v25  ;;  %vm83_vm9 = vcmp.eq.s32.totalorder %v63_v27, %v598_v25  ;;  %vm84_vm11 = vcmp.eq.s32.totalorder %v64_v29, %v598_v25  ;;  %vm85_vm12 = vcmp.eq.s32.totalorder %v65_v30, %v598_v25 }
  0x40   :  { %408 = vmatprep.subr.msk.bf16.mxu0 %vm407_vm6, %v539_v28  ;;  %439 = vmatprep.subr.msk.bf16.mxu1 %vm407_vm6, %v539_v28  ;;  %vm411_vm7 = vmpackc.low %vm81_vm5, %vm80_vm4  ;;  %vm86_vm14 = vcmp.eq.s32.totalorder %v66_v31, %v598_v25  ;;  %vm87_vm15 = vcmp.eq.s32.totalorder %v67_v32, %v598_v25  ;;  %vm88_vm1 = vcmp.eq.s32.totalorder %v68_v33, %v598_v25 }
  0x41   :  { %410 = vmatpush3.bf16.msk.msra.mxu0 %vm407_vm6, %v539_v28  ;;  %447 = vmatpush3.bf16.msk.msra.mxu1 %vm407_vm6, %v539_v28  ;;  %vm415_vm10 = vmpackc.low %vm83_vm9, %vm82_vm8  ;;  %vm89_vm2 = vcmp.eq.s32.totalorder %v69_v34, %v598_v25  ;;  %vm90_vm4 = vcmp.eq.s32.totalorder %v70_v35, %v598_v25  ;;  %vm91_vm5 = vcmp.eq.s32.totalorder %v71_v36, %v598_v25 }
  0x42   :  { %412 = vmatprep.subr.msk.bf16.mxu0 %vm411_vm7, %v539_v28  ;;  %440 = vmatprep.subr.msk.bf16.mxu1 %vm411_vm7, %v539_v28  ;;  %vm419_vm13 = vmpackc.low %vm85_vm12, %vm84_vm11  ;;  %vm93_vm8 = vcmp.eq.s32.totalorder %v73_v38, %v598_v25  ;;  %v275_v1 = vrot.slane %v271_v55, %v592_v20  ;;  %v285_v18 = vrot.slane %v271_v55, %v250_v47 }
  0x43   :  { %vm423_vm0 = vmpackc.low %vm87_vm15, %vm86_vm14 }
  0x44   :  { %vm427_vm3 = vmpackc.low %vm89_vm2, %vm88_vm1 }
  0x45   :  { %414 = vmatpush3.bf16.msk.msra.mxu0 %vm411_vm7, %v539_v28  ;;  %448 = vmatpush3.bf16.msk.msra.mxu1 %vm411_vm7, %v539_v28  ;;  %vm431_vm6 = vmpackc.low %vm91_vm5, %vm90_vm4  ;;  %vm92_vm7 = vcmp.eq.s32.totalorder %v72_v37, %v598_v25 }
  0x46   :  { %416 = vmatprep.subr.msk.bf16.mxu0 %vm415_vm10, %v539_v28  ;;  %441 = vmatprep.subr.msk.bf16.mxu1 %vm415_vm10, %v539_v28  ;;  %vm435_vm9 = vmpackc.low %vm93_vm8, %vm92_vm7 }
  0x49   :  { %418 = vmatpush3.bf16.msk.msra.mxu0 %vm415_vm10, %v539_v28  ;;  %449 = vmatpush3.bf16.msk.msra.mxu1 %vm415_vm10, %v539_v28 }
  0x4a   :  { %420 = vmatprep.subr.msk.bf16.mxu0 %vm419_vm13, %v539_v28  ;;  %442 = vmatprep.subr.msk.bf16.mxu1 %vm419_vm13, %v539_v28 }
  0x4d   :  { %422 = vmatpush3.bf16.msk.msra.mxu0 %vm419_vm13, %v539_v28  ;;  %450 = vmatpush3.bf16.msk.msra.mxu1 %vm419_vm13, %v539_v28 }
  0x4e   :  { %424 = vmatprep.subr.msk.bf16.mxu0 %vm423_vm0, %v539_v28  ;;  %443 = vmatprep.subr.msk.bf16.mxu1 %vm423_vm0, %v539_v28 }
  0x51   :  { %426 = vmatpush3.bf16.msk.msra.mxu0 %vm423_vm0, %v539_v28  ;;  %451 = vmatpush3.bf16.msk.msra.mxu1 %vm423_vm0, %v539_v28 }
  0x52   :  { %428 = vmatprep.subr.msk.bf16.mxu0 %vm427_vm3, %v539_v28  ;;  %444 = vmatprep.subr.msk.bf16.mxu1 %vm427_vm3, %v539_v28 }
  0x55   :  { %430 = vmatpush3.bf16.msk.msra.mxu0 %vm427_vm3, %v539_v28  ;;  %452 = vmatpush3.bf16.msk.msra.mxu1 %vm427_vm3, %v539_v28 }
  0x56   :  { %432 = vmatprep.subr.msk.bf16.mxu0 %vm431_vm6, %v539_v28  ;;  %445 = vmatprep.subr.msk.bf16.mxu1 %vm431_vm6, %v539_v28 }
  0x59   :  { %434 = vmatpush3.bf16.msk.msra.mxu0 %vm431_vm6, %v539_v28  ;;  %453 = vmatpush3.bf16.msk.msra.mxu1 %vm431_vm6, %v539_v28 }
  0x5a   :  { %436 = vmatprep.subr.msk.bf16.mxu0 %vm435_vm9, %v539_v28  ;;  %446 = vmatprep.subr.msk.bf16.mxu1 %vm435_vm9, %v539_v28 }
  0x5d   :  { %438 = vmatpush3.bf16.msk.msra.mxu0 %vm435_vm9, %v539_v28  ;;  %454 = vmatpush3.bf16.msk.msra.mxu1 %vm435_vm9, %v539_v28 }
  0x60   :  { %396 = vmatmul.mubr.f32.vlgmr.msra.gmra.mrb[0].mxu0 %v127_v39  ;;  %402 = vmatmul.mubr.f32.vlgmr.msra.gmra.mrb[0].mxu1 %v131_v40 }
  0x61   :  { %398 = vmatprep.mubr.f32.mxu0 %v128_v41  ;;  %404 = vmatprep.mubr.f32.mxu1 %v132_v42 }
  0x64   :  { %399 = vmatmul.mubr.f32.gmra.mrb[2].mxu0 %v129_v43  ;;  %405 = vmatmul.mubr.f32.gmra.mrb[2].mxu1 %v133_v44 }
 0x133   :  { %v397_v53 = vpop.f32.mrb[0].mxu0  ;;  %v403_v54 = vpop.f32.mrb[0].mxu1 }
 0x134   :  { %v257_v56 = vmul.f32 %v397_v53, %v251_v50  ;;  %v263_v57 = vmul.f32 %v403_v54, %v251_v50  ;;  %v200_v58 = vpop.f32.mrb[1].mxu0  ;;  %v220_v59 = vpop.f32.mrb[1].mxu1 }
 0x135   :  { %v256_v61 = vmul.f32 %v242_v51, %v200_v58  ;;  %v262_v62 = vmul.f32 %v247_v52, %v220_v59 }
 0x137   :  { %v258_v63 = vadd.f32 %v257_v56, %v256_v61  ;;  %v264_v0 = vadd.f32 %v263_v57, %v262_v62  ;;  %v400_v2 = vpop.f32.mrb[2].mxu0  ;;  %v406_v3 = vpop.f32.mrb[2].mxu1 }
 0x138   :  { %v260_v4 = vmul.f32 %v400_v2, %v255_v60  ;;  %v266_v5 = vmul.f32 %v406_v3, %v255_v60  ;;  %v210_v6 = vpop.f32.mrb[3].mxu0  ;;  %v230_v7 = vpop.f32.mrb[3].mxu1 }
 0x139   :  { %v276_v8 = vsub.f32 %v264_v0, %v258_v63  ;;  %v259_v9 = vmul.f32 %v242_v51, %v210_v6  ;;  %v265_v10 = vmul.f32 %v247_v52, %v230_v7 }
 0x13b   :  { %v277_v11 = vmul.f32 %v276_v8, %v275_v1  ;;  %v261_v12 = vadd.f32 %v260_v4, %v259_v9  ;;  %v267_v13 = vadd.f32 %v266_v5, %v265_v10 }
 0x13d   :  { %v279_v14 = vsub.f32 %v267_v13, %v261_v12  ;;  %v278_v15 = vadd.f32 %v277_v11, %v258_v63 }
 0x13f   :  { %v280_v16 = vmul.f32 %v279_v14, %v275_v1 }
 0x141   :  { %v281_v17 = vadd.f32 %v280_v16, %v261_v12 }
 0x143   :  { %v286_v19 = vsub.f32 %v281_v17, %v278_v15 }
 0x145   :  { %v287_v20 = vmul.f32 %v286_v19, %v285_v18 }
 0x147   :  { %v288_v21 = vadd.f32 %v287_v20, %v278_v15 }
 0x149   :  { %289 = vst [vmem:[#allocation7] sm:$0xff] %v288_v21 }
 0x14a   :  { %518 = shalt.err (!%p515_p6)
}
 0x14b   :  { %s519_s10 = scalar_lea.hbm %s653_s2, 128 }
 0x14c   :  { %p520_p7 = scmp.ne.s32.totalorder %s653_s2, %s519_s10  ;;  %p523_p8 = scmp.lt.u32.totalorder %s519_s10, %s653_s2 }
 0x14e   :  { %p525_p9 = pnand %p523_p8, %p520_p7 }
 0x150   :  { %528 = shalt.err (!%p525_p9)
}
 0x151   :  { %299 = dma.vmem_to_hbm [thread:$0]  %s297_s6, 128, %s653_s2, [#allocation4]  }
 0x152   :  { %533 = dma.done.wait [#allocation4], 128  }
 0x153   :  { %534 = vsyncadd [#allocation4], 4294967168 }
 0x154   :  { %303 = vsyncpa [#allocation3], 1 }
 0x155   :  { %304 = vsyncpa [#allocation6], 1 }
 0x156   :  { %305 = vsyncpa [#allocation4], 1 }

</bundles_post_ra>
